<compile_context>
chip_gen: v7x
topology: tpu7x:2x2x1
jax: 0.10.0
libtpu: 0.0.40
codegen_flags: <defaults>
</compile_context>

<pallas_src>
import functools
import math

import jax
import jax.numpy as jnp
from jax import lax
from jax.experimental import pallas as pl
from jax.experimental.pallas import tpu as pltpu


def _mha_kernel(q_ref, k_ref, v_ref, wq_ref, wk_ref, wv_ref, wo_ref, b_ref,
                out_ref, *, h, d_k, d_v):
    """One grid step == one batch element; all heads fused inside."""
    f32 = jnp.float32
    bf16 = jnp.bfloat16
    scale = 1.0 / math.sqrt(d_k)

    xq = q_ref[0].astype(bf16)                    # (S, D)
    xk = k_ref[0].astype(bf16)
    xv = v_ref[0].astype(bf16)

    # Fused projections across heads: one full-width bf16 MXU matmul each,
    # f32 accumulation. Scale folded into the (small) projected q.
    q_p = jnp.dot(xq, wq_ref[...].astype(bf16), preferred_element_type=f32) * scale
    k_p = jnp.dot(xk, wk_ref[...].astype(bf16), preferred_element_type=f32)
    v_p = jnp.dot(xv, wv_ref[...].astype(bf16), preferred_element_type=f32)

    # Per-head scaled dot-product attention (static unroll; h is small).
    ctx = []
    for hh in range(h):
        qh = q_p[:, hh * d_k:(hh + 1) * d_k].astype(bf16)
        kh = k_p[:, hh * d_k:(hh + 1) * d_k].astype(bf16)
        vh = v_p[:, hh * d_v:(hh + 1) * d_v].astype(bf16)
        # scores = qh @ kh^T (contract last dims), f32 accumulation.
        s = lax.dot_general(qh, kh, (((1,), (1,)), ((), ())),
                            preferred_element_type=f32)
        # Softmax kept in f32 (v5e VPU/EUP have no bf16 path anyway).
        m = jnp.max(s, axis=-1, keepdims=True)
        p = jnp.exp(s - m)
        attn = p * pl.reciprocal(jnp.sum(p, axis=-1, keepdims=True), approx=True)
        ctx.append(jnp.dot(attn.astype(bf16), vh, preferred_element_type=f32))

    cat = jnp.concatenate(ctx, axis=-1)           # (S, h*d_v), head-major columns

    # Single fused output projection + bias (once per grid step).
    out = jnp.dot(cat.astype(bf16), wo_ref[...].astype(bf16),
                  preferred_element_type=f32)
    out_ref[0] = out + b_ref[...]


def multi_head_attention(q, k, v, w_q, w_k, w_v, w_out, b_out):
    """q,k,v: (B,S,D);  w_q/w_k/w_v: (h,D,d_k);  w_out: (D, h*d_v);  b_out: (D,)."""
    B, S, D = q.shape
    h, _, d_k = w_q.shape
    d_v = w_v.shape[-1]

    # Glue: fuse per-head projection weights so head hh owns output columns
    # [hh*d_k, (hh+1)*d_k); pre-transpose the output Linear weight.
    wq_cat = jnp.transpose(w_q, (1, 0, 2)).reshape(D, h * d_k)
    wk_cat = jnp.transpose(w_k, (1, 0, 2)).reshape(D, h * d_k)
    wv_cat = jnp.transpose(w_v, (1, 0, 2)).reshape(D, h * d_v)
    w_lin = jnp.transpose(w_out)                  # (h*d_v, D)
    bias2d = b_out.reshape(1, D)

    kernel = functools.partial(_mha_kernel, h=h, d_k=d_k, d_v=d_v)
    return pl.pallas_call(
        kernel,
        out_shape=jax.ShapeDtypeStruct((B, S, D), jnp.float32),
        grid_spec=pltpu.PrefetchScalarGridSpec(
            num_scalar_prefetch=0,
            grid=(B,),
            in_specs=[
                pl.BlockSpec((1, S, D), lambda b: (b, 0, 0)),        # q[b]
                pl.BlockSpec((1, S, D), lambda b: (b, 0, 0)),        # k[b]
                pl.BlockSpec((1, S, D), lambda b: (b, 0, 0)),        # v[b]
                pl.BlockSpec((D, h * d_k), lambda b: (0, 0)),        # W_q fused
                pl.BlockSpec((D, h * d_k), lambda b: (0, 0)),        # W_k fused
                pl.BlockSpec((D, h * d_v), lambda b: (0, 0)),        # W_v fused
                pl.BlockSpec((h * d_v, D), lambda b: (0, 0)),        # W_out^T
                pl.BlockSpec((1, D), lambda b: (0, 0)),              # bias
            ],
            out_specs=pl.BlockSpec((1, S, D), lambda b: (b, 0, 0)),
        ),
        compiler_params=pltpu.CompilerParams(
            dimension_semantics=("parallel",)),
    )(q, k, v, wq_cat, wk_cat, wv_cat, w_lin, bias2d)


def _reference(q, k, v, w_q, w_k, w_v, w_out, b_out):
    """Pure-JAX f32 reference of the intended forward pass."""
    h, D, d_k = w_q.shape
    qp = jnp.einsum('bsd,hdk->hbsk', q, w_q)
    kp = jnp.einsum('bsd,hdk->hbsk', k, w_k)
    vp = jnp.einsum('bsd,hdk->hbsk', v, w_v)
    scores = jnp.einsum('hbqk,hbsk->hbqs', qp, kp) / math.sqrt(d_k)
    attn = jax.nn.softmax(scores, axis=-1)
    ctx = jnp.einsum('hbqs,hbsv->hbqv', attn, vp)               # (h, B, S, d_v)
    cat = jnp.concatenate([ctx[i] for i in range(h)], axis=-1)  # chunk(dim=0) + cat(dim=2)
    return cat @ w_out.T + b_out


if __name__ == "__main__":
    B, S, d_model, h = 2, 8, 32, 4
    d_k = d_v = d_model // h

    key = jax.random.PRNGKey(0)
    ks = jax.random.split(key, 8)
    q = jax.random.normal(ks[0], (B, S, d_model), jnp.float32)
    k = jax.random.normal(ks[1], (B, S, d_model), jnp.float32)
    v = jax.random.normal(ks[2], (B, S, d_model), jnp.float32)
    # Deterministic synthetic parameters (module's __init__ leaves them uninitialized).
    w_q = jax.random.normal(ks[3], (h, d_model, d_k), jnp.float32) * 0.1
    w_k = jax.random.normal(ks[4], (h, d_model, d_k), jnp.float32) * 0.1
    w_v = jax.random.normal(ks[5], (h, d_model, d_v), jnp.float32) * 0.1
    w_out = jax.random.normal(ks[6], (d_model, h * d_v), jnp.float32) * 0.1
    b_out = jax.random.normal(ks[7], (d_model,), jnp.float32) * 0.1

    out = multi_head_attention(q, k, v, w_q, w_k, w_v, w_out, b_out)
    out = jax.block_until_ready(out)

    ref = _reference(q, k, v, w_q, w_k, w_v, w_out, b_out)
    assert out.shape == (B, S, d_model)
    # Kernel uses bf16 MXU operands (f32 accumulation) -> compare against the f32
    # reference at bf16-appropriate tolerance.
    assert jnp.allclose(out, ref, rtol=2e-2, atol=2e-2), "mismatch vs JAX reference"
    print("KERNEL_OK")
</pallas_src>

<mosaic_0001>
module attributes {stable_mosaic.version = 11 : i64} {
  func.func @_mha_kernel(%arg0: i32, %arg1: memref<1x8x32xf32, #tpu.memory_space<vmem>>, %arg2: memref<1x8x32xf32, #tpu.memory_space<vmem>>, %arg3: memref<1x8x32xf32, #tpu.memory_space<vmem>>, %arg4: memref<32x32xf32, #tpu.memory_space<vmem>>, %arg5: memref<32x32xf32, #tpu.memory_space<vmem>>, %arg6: memref<32x32xf32, #tpu.memory_space<vmem>>, %arg7: memref<32x32xf32, #tpu.memory_space<vmem>>, %arg8: memref<1x32xf32, #tpu.memory_space<vmem>>, %arg9: memref<1x8x32xf32, #tpu.memory_space<vmem>>) attributes {dimension_semantics = [#tpu.dimension_semantics<parallel>], iteration_bounds = array<i64: 2>, scalar_prefetch = 0 : i64, scratch_operands = 0 : i64, tpu.core_type = #tpu.core_type<tc>, window_params = [{transform_indices = @transform_0, window_bounds = array<i64: 1, 8, 32>}, {transform_indices = @transform_1, window_bounds = array<i64: 1, 8, 32>}, {transform_indices = @transform_2, window_bounds = array<i64: 1, 8, 32>}, {pipeline_mode = #tpu.pipeline_mode<synchronous>, transform_indices = @transform_3, window_bounds = array<i64: 32, 32>}, {pipeline_mode = #tpu.pipeline_mode<synchronous>, transform_indices = @transform_4, window_bounds = array<i64: 32, 32>}, {pipeline_mode = #tpu.pipeline_mode<synchronous>, transform_indices = @transform_5, window_bounds = array<i64: 32, 32>}, {pipeline_mode = #tpu.pipeline_mode<synchronous>, transform_indices = @transform_6, window_bounds = array<i64: 32, 32>}, {pipeline_mode = #tpu.pipeline_mode<synchronous>, transform_indices = @transform_7, window_bounds = array<i64: 1, 32>}, {transform_indices = @transform_8, window_bounds = array<i64: 1, 8, 32>}]} {
    %c0 = arith.constant 0 : index
    %c0_0 = arith.constant 0 : index
    %c0_1 = arith.constant 0 : index
    %0 = vector.load %arg1[%c0, %c0_0, %c0_1] : memref<1x8x32xf32, #tpu.memory_space<vmem>>, vector<1x8x32xf32>
    %1 = vector.shape_cast %0 : vector<1x8x32xf32> to vector<8x32xf32>
    %2 = arith.truncf %1 : vector<8x32xf32> to vector<8x32xbf16>
    %c0_2 = arith.constant 0 : index
    %c0_3 = arith.constant 0 : index
    %c0_4 = arith.constant 0 : index
    %3 = vector.load %arg2[%c0_2, %c0_3, %c0_4] : memref<1x8x32xf32, #tpu.memory_space<vmem>>, vector<1x8x32xf32>
    %4 = vector.shape_cast %3 : vector<1x8x32xf32> to vector<8x32xf32>
    %5 = arith.truncf %4 : vector<8x32xf32> to vector<8x32xbf16>
    %c0_5 = arith.constant 0 : index
    %c0_6 = arith.constant 0 : index
    %c0_7 = arith.constant 0 : index
    %6 = vector.load %arg3[%c0_5, %c0_6, %c0_7] : memref<1x8x32xf32, #tpu.memory_space<vmem>>, vector<1x8x32xf32>
    %7 = vector.shape_cast %6 : vector<1x8x32xf32> to vector<8x32xf32>
    %8 = arith.truncf %7 : vector<8x32xf32> to vector<8x32xbf16>
    %c0_8 = arith.constant 0 : index
    %c0_9 = arith.constant 0 : index
    %9 = vector.load %arg4[%c0_8, %c0_9] : memref<32x32xf32, #tpu.memory_space<vmem>>, vector<32x32xf32>
    %10 = arith.truncf %9 : vector<32x32xf32> to vector<32x32xbf16>
    %cst = arith.constant dense<0.000000e+00> : vector<8x32xf32>
    %11 = tpu.matmul %2, %10, %cst {dimension_numbers = #tpu.dot_dimension_numbers<[1], [0], [0], [1], [0, 0, 1, 1], [], []>} : vector<8x32xbf16>, vector<32x32xbf16>, vector<8x32xf32> -> vector<8x32xf32>
    %cst_10 = arith.constant 0.353553385 : f32
    %12 = vector.broadcast %cst_10 : f32 to vector<8x32xf32>
    %13 = arith.mulf %11, %12 : vector<8x32xf32>
    %c0_11 = arith.constant 0 : index
    %c0_12 = arith.constant 0 : index
    %14 = vector.load %arg5[%c0_11, %c0_12] : memref<32x32xf32, #tpu.memory_space<vmem>>, vector<32x32xf32>
    %15 = arith.truncf %14 : vector<32x32xf32> to vector<32x32xbf16>
    %cst_13 = arith.constant dense<0.000000e+00> : vector<8x32xf32>
    %16 = tpu.matmul %5, %15, %cst_13 {dimension_numbers = #tpu.dot_dimension_numbers<[1], [0], [0], [1], [0, 0, 1, 1], [], []>} : vector<8x32xbf16>, vector<32x32xbf16>, vector<8x32xf32> -> vector<8x32xf32>
    %c0_14 = arith.constant 0 : index
    %c0_15 = arith.constant 0 : index
    %17 = vector.load %arg6[%c0_14, %c0_15] : memref<32x32xf32, #tpu.memory_space<vmem>>, vector<32x32xf32>
    %18 = arith.truncf %17 : vector<32x32xf32> to vector<32x32xbf16>
    %cst_16 = arith.constant dense<0.000000e+00> : vector<8x32xf32>
    %19 = tpu.matmul %8, %18, %cst_16 {dimension_numbers = #tpu.dot_dimension_numbers<[1], [0], [0], [1], [0, 0, 1, 1], [], []>} : vector<8x32xbf16>, vector<32x32xbf16>, vector<8x32xf32> -> vector<8x32xf32>
    %20 = vector.extract_strided_slice %13 {offsets = [0, 0], sizes = [8, 8], strides = [1, 1]} : vector<8x32xf32> to vector<8x8xf32>
    %21 = arith.truncf %20 : vector<8x8xf32> to vector<8x8xbf16>
    %22 = vector.extract_strided_slice %16 {offsets = [0, 0], sizes = [8, 8], strides = [1, 1]} : vector<8x32xf32> to vector<8x8xf32>
    %23 = arith.truncf %22 : vector<8x8xf32> to vector<8x8xbf16>
    %24 = vector.extract_strided_slice %19 {offsets = [0, 0], sizes = [8, 8], strides = [1, 1]} : vector<8x32xf32> to vector<8x8xf32>
    %25 = arith.truncf %24 : vector<8x8xf32> to vector<8x8xbf16>
    %cst_17 = arith.constant dense<0.000000e+00> : vector<8x8xf32>
    %26 = tpu.matmul %21, %23, %cst_17 {dimension_numbers = #tpu.dot_dimension_numbers<[1], [1], [0], [0], [0, 0, 1, 0], [], []>} : vector<8x8xbf16>, vector<8x8xbf16>, vector<8x8xf32> -> vector<8x8xf32>
    %cst_18 = arith.constant dense<0xFF800000> : vector<8xf32>
    %27 = vector.multi_reduction <maximumf>, %26, %cst_18 [1] : vector<8x8xf32> to vector<8xf32>
    %28 = vector.shape_cast %27 : vector<8xf32> to vector<8x1xf32>
    %29 = vector.broadcast %28 : vector<8x1xf32> to vector<8x8xf32>
    %30 = arith.subf %26, %29 : vector<8x8xf32>
    %31 = math.exp %30 : vector<8x8xf32>
    %cst_19 = arith.constant dense<0.000000e+00> : vector<8xf32>
    %32 = vector.multi_reduction <add>, %31, %cst_19 [1] : vector<8x8xf32> to vector<8xf32>
    %33 = vector.shape_cast %32 : vector<8xf32> to vector<8x1xf32>
    %34 = tpu.reciprocal %33 {approx = true} : vector<8x1xf32> -> vector<8x1xf32>
    %35 = vector.broadcast %34 : vector<8x1xf32> to vector<8x8xf32>
    %36 = arith.mulf %31, %35 : vector<8x8xf32>
    %37 = arith.truncf %36 : vector<8x8xf32> to vector<8x8xbf16>
    %cst_20 = arith.constant dense<0.000000e+00> : vector<8x8xf32>
    %38 = tpu.matmul %37, %25, %cst_20 {dimension_numbers = #tpu.dot_dimension_numbers<[1], [0], [0], [1], [0, 0, 1, 1], [], []>} : vector<8x8xbf16>, vector<8x8xbf16>, vector<8x8xf32> -> vector<8x8xf32>
    %39 = vector.extract_strided_slice %13 {offsets = [0, 8], sizes = [8, 8], strides = [1, 1]} : vector<8x32xf32> to vector<8x8xf32>
    %40 = arith.truncf %39 : vector<8x8xf32> to vector<8x8xbf16>
    %41 = vector.extract_strided_slice %16 {offsets = [0, 8], sizes = [8, 8], strides = [1, 1]} : vector<8x32xf32> to vector<8x8xf32>
    %42 = arith.truncf %41 : vector<8x8xf32> to vector<8x8xbf16>
    %43 = vector.extract_strided_slice %19 {offsets = [0, 8], sizes = [8, 8], strides = [1, 1]} : vector<8x32xf32> to vector<8x8xf32>
    %44 = arith.truncf %43 : vector<8x8xf32> to vector<8x8xbf16>
    %cst_21 = arith.constant dense<0.000000e+00> : vector<8x8xf32>
    %45 = tpu.matmul %40, %42, %cst_21 {dimension_numbers = #tpu.dot_dimension_numbers<[1], [1], [0], [0], [0, 0, 1, 0], [], []>} : vector<8x8xbf16>, vector<8x8xbf16>, vector<8x8xf32> -> vector<8x8xf32>
    %cst_22 = arith.constant dense<0xFF800000> : vector<8xf32>
    %46 = vector.multi_reduction <maximumf>, %45, %cst_22 [1] : vector<8x8xf32> to vector<8xf32>
    %47 = vector.shape_cast %46 : vector<8xf32> to vector<8x1xf32>
    %48 = vector.broadcast %47 : vector<8x1xf32> to vector<8x8xf32>
    %49 = arith.subf %45, %48 : vector<8x8xf32>
    %50 = math.exp %49 : vector<8x8xf32>
    %cst_23 = arith.constant dense<0.000000e+00> : vector<8xf32>
    %51 = vector.multi_reduction <add>, %50, %cst_23 [1] : vector<8x8xf32> to vector<8xf32>
    %52 = vector.shape_cast %51 : vector<8xf32> to vector<8x1xf32>
    %53 = tpu.reciprocal %52 {approx = true} : vector<8x1xf32> -> vector<8x1xf32>
    %54 = vector.broadcast %53 : vector<8x1xf32> to vector<8x8xf32>
    %55 = arith.mulf %50, %54 : vector<8x8xf32>
    %56 = arith.truncf %55 : vector<8x8xf32> to vector<8x8xbf16>
    %cst_24 = arith.constant dense<0.000000e+00> : vector<8x8xf32>
    %57 = tpu.matmul %56, %44, %cst_24 {dimension_numbers = #tpu.dot_dimension_numbers<[1], [0], [0], [1], [0, 0, 1, 1], [], []>} : vector<8x8xbf16>, vector<8x8xbf16>, vector<8x8xf32> -> vector<8x8xf32>
    %58 = vector.extract_strided_slice %13 {offsets = [0, 16], sizes = [8, 8], strides = [1, 1]} : vector<8x32xf32> to vector<8x8xf32>
    %59 = arith.truncf %58 : vector<8x8xf32> to vector<8x8xbf16>
    %60 = vector.extract_strided_slice %16 {offsets = [0, 16], sizes = [8, 8], strides = [1, 1]} : vector<8x32xf32> to vector<8x8xf32>
    %61 = arith.truncf %60 : vector<8x8xf32> to vector<8x8xbf16>
    %62 = vector.extract_strided_slice %19 {offsets = [0, 16], sizes = [8, 8], strides = [1, 1]} : vector<8x32xf32> to vector<8x8xf32>
    %63 = arith.truncf %62 : vector<8x8xf32> to vector<8x8xbf16>
    %cst_25 = arith.constant dense<0.000000e+00> : vector<8x8xf32>
    %64 = tpu.matmul %59, %61, %cst_25 {dimension_numbers = #tpu.dot_dimension_numbers<[1], [1], [0], [0], [0, 0, 1, 0], [], []>} : vector<8x8xbf16>, vector<8x8xbf16>, vector<8x8xf32> -> vector<8x8xf32>
    %cst_26 = arith.constant dense<0xFF800000> : vector<8xf32>
    %65 = vector.multi_reduction <maximumf>, %64, %cst_26 [1] : vector<8x8xf32> to vector<8xf32>
    %66 = vector.shape_cast %65 : vector<8xf32> to vector<8x1xf32>
    %67 = vector.broadcast %66 : vector<8x1xf32> to vector<8x8xf32>
    %68 = arith.subf %64, %67 : vector<8x8xf32>
    %69 = math.exp %68 : vector<8x8xf32>
    %cst_27 = arith.constant dense<0.000000e+00> : vector<8xf32>
    %70 = vector.multi_reduction <add>, %69, %cst_27 [1] : vector<8x8xf32> to vector<8xf32>
    %71 = vector.shape_cast %70 : vector<8xf32> to vector<8x1xf32>
    %72 = tpu.reciprocal %71 {approx = true} : vector<8x1xf32> -> vector<8x1xf32>
    %73 = vector.broadcast %72 : vector<8x1xf32> to vector<8x8xf32>
    %74 = arith.mulf %69, %73 : vector<8x8xf32>
    %75 = arith.truncf %74 : vector<8x8xf32> to vector<8x8xbf16>
    %cst_28 = arith.constant dense<0.000000e+00> : vector<8x8xf32>
    %76 = tpu.matmul %75, %63, %cst_28 {dimension_numbers = #tpu.dot_dimension_numbers<[1], [0], [0], [1], [0, 0, 1, 1], [], []>} : vector<8x8xbf16>, vector<8x8xbf16>, vector<8x8xf32> -> vector<8x8xf32>
    %77 = vector.extract_strided_slice %13 {offsets = [0, 24], sizes = [8, 8], strides = [1, 1]} : vector<8x32xf32> to vector<8x8xf32>
    %78 = arith.truncf %77 : vector<8x8xf32> to vector<8x8xbf16>
    %79 = vector.extract_strided_slice %16 {offsets = [0, 24], sizes = [8, 8], strides = [1, 1]} : vector<8x32xf32> to vector<8x8xf32>
    %80 = arith.truncf %79 : vector<8x8xf32> to vector<8x8xbf16>
    %81 = vector.extract_strided_slice %19 {offsets = [0, 24], sizes = [8, 8], strides = [1, 1]} : vector<8x32xf32> to vector<8x8xf32>
    %82 = arith.truncf %81 : vector<8x8xf32> to vector<8x8xbf16>
    %cst_29 = arith.constant dense<0.000000e+00> : vector<8x8xf32>
    %83 = tpu.matmul %78, %80, %cst_29 {dimension_numbers = #tpu.dot_dimension_numbers<[1], [1], [0], [0], [0, 0, 1, 0], [], []>} : vector<8x8xbf16>, vector<8x8xbf16>, vector<8x8xf32> -> vector<8x8xf32>
    %cst_30 = arith.constant dense<0xFF800000> : vector<8xf32>
    %84 = vector.multi_reduction <maximumf>, %83, %cst_30 [1] : vector<8x8xf32> to vector<8xf32>
    %85 = vector.shape_cast %84 : vector<8xf32> to vector<8x1xf32>
    %86 = vector.broadcast %85 : vector<8x1xf32> to vector<8x8xf32>
    %87 = arith.subf %83, %86 : vector<8x8xf32>
    %88 = math.exp %87 : vector<8x8xf32>
    %cst_31 = arith.constant dense<0.000000e+00> : vector<8xf32>
    %89 = vector.multi_reduction <add>, %88, %cst_31 [1] : vector<8x8xf32> to vector<8xf32>
    %90 = vector.shape_cast %89 : vector<8xf32> to vector<8x1xf32>
    %91 = tpu.reciprocal %90 {approx = true} : vector<8x1xf32> -> vector<8x1xf32>
    %92 = vector.broadcast %91 : vector<8x1xf32> to vector<8x8xf32>
    %93 = arith.mulf %88, %92 : vector<8x8xf32>
    %94 = arith.truncf %93 : vector<8x8xf32> to vector<8x8xbf16>
    %cst_32 = arith.constant dense<0.000000e+00> : vector<8x8xf32>
    %95 = tpu.matmul %94, %82, %cst_32 {dimension_numbers = #tpu.dot_dimension_numbers<[1], [0], [0], [1], [0, 0, 1, 1], [], []>} : vector<8x8xbf16>, vector<8x8xbf16>, vector<8x8xf32> -> vector<8x8xf32>
    %96 = tpu.concatenate %38, %57, %76, %95 in 1 : vector<8x8xf32>, vector<8x8xf32>, vector<8x8xf32>, vector<8x8xf32> -> vector<8x32xf32>
    %97 = arith.truncf %96 : vector<8x32xf32> to vector<8x32xbf16>
    %c0_33 = arith.constant 0 : index
    %c0_34 = arith.constant 0 : index
    %98 = vector.load %arg7[%c0_33, %c0_34] : memref<32x32xf32, #tpu.memory_space<vmem>>, vector<32x32xf32>
    %99 = arith.truncf %98 : vector<32x32xf32> to vector<32x32xbf16>
    %cst_35 = arith.constant dense<0.000000e+00> : vector<8x32xf32>
    %100 = tpu.matmul %97, %99, %cst_35 {dimension_numbers = #tpu.dot_dimension_numbers<[1], [0], [0], [1], [0, 0, 1, 1], [], []>} : vector<8x32xbf16>, vector<32x32xbf16>, vector<8x32xf32> -> vector<8x32xf32>
    %c0_36 = arith.constant 0 : index
    %c0_37 = arith.constant 0 : index
    %101 = vector.load %arg8[%c0_36, %c0_37] : memref<1x32xf32, #tpu.memory_space<vmem>>, vector<1x32xf32>
    %102 = vector.broadcast %101 : vector<1x32xf32> to vector<8x32xf32>
    %103 = arith.addf %100, %102 : vector<8x32xf32>
    %c0_38 = arith.constant 0 : index
    %c0_39 = arith.constant 0 : index
    %c0_40 = arith.constant 0 : index
    %104 = vector.load %arg9[%c0_38, %c0_39, %c0_40] : memref<1x8x32xf32, #tpu.memory_space<vmem>>, vector<1x8x32xf32>
    %105 = vector.shape_cast %104 : vector<1x8x32xf32> to vector<8x32xf32>
    %106 = vector.shape_cast %103 : vector<8x32xf32> to vector<1x8x32xf32>
    tpu.vector_store %arg9[%c0_38, %c0_39, %c0_40], %106 {strides = array<i32>} : memref<1x8x32xf32, #tpu.memory_space<vmem>>, vector<1x8x32xf32>,
    return
  }
  func.func @transform_0(%arg0: i32) -> (i32, i32, i32) {
    %c0_i32 = arith.constant 0 : i32
    %c0_i32_0 = arith.constant 0 : i32
    %c0_i32_1 = arith.constant 0 : i32
    return %arg0, %c0_i32, %c0_i32_0 : i32, i32, i32
  }
  func.func @transform_1(%arg0: i32) -> (i32, i32, i32) {
    %c0_i32 = arith.constant 0 : i32
    %c0_i32_0 = arith.constant 0 : i32
    %c0_i32_1 = arith.constant 0 : i32
    return %arg0, %c0_i32, %c0_i32_0 : i32, i32, i32
  }
  func.func @transform_2(%arg0: i32) -> (i32, i32, i32) {
    %c0_i32 = arith.constant 0 : i32
    %c0_i32_0 = arith.constant 0 : i32
    %c0_i32_1 = arith.constant 0 : i32
    return %arg0, %c0_i32, %c0_i32_0 : i32, i32, i32
  }
  func.func @transform_3(%arg0: i32) -> (i32, i32) {
    %c0_i32 = arith.constant 0 : i32
    %c0_i32_0 = arith.constant 0 : i32
    %c0_i32_1 = arith.constant 0 : i32
    return %c0_i32, %c0_i32_0 : i32, i32
  }
  func.func @transform_4(%arg0: i32) -> (i32, i32) {
    %c0_i32 = arith.constant 0 : i32
    %c0_i32_0 = arith.constant 0 : i32
    %c0_i32_1 = arith.constant 0 : i32
    return %c0_i32, %c0_i32_0 : i32, i32
  }
  func.func @transform_5(%arg0: i32) -> (i32, i32) {
    %c0_i32 = arith.constant 0 : i32
    %c0_i32_0 = arith.constant 0 : i32
    %c0_i32_1 = arith.constant 0 : i32
    return %c0_i32, %c0_i32_0 : i32, i32
  }
  func.func @transform_6(%arg0: i32) -> (i32, i32) {
    %c0_i32 = arith.constant 0 : i32
    %c0_i32_0 = arith.constant 0 : i32
    %c0_i32_1 = arith.constant 0 : i32
    return %c0_i32, %c0_i32_0 : i32, i32
  }
  func.func @transform_7(%arg0: i32) -> (i32, i32) {
    %c0_i32 = arith.constant 0 : i32
    %c0_i32_0 = arith.constant 0 : i32
    %c0_i32_1 = arith.constant 0 : i32
    return %c0_i32, %c0_i32_0 : i32, i32
  }
  func.func @transform_8(%arg0: i32) -> (i32, i32, i32) {
    %c0_i32 = arith.constant 0 : i32
    %c0_i32_0 = arith.constant 0 : i32
    %c0_i32_1 = arith.constant 0 : i32
    return %arg0, %c0_i32, %c0_i32_0 : i32, i32, i32
  }
}

</mosaic_0001>

<bundles_post_ra>
// kernel: tpu_custom_call.1
= control target key start
LH: loop header
LB: loop body
LE: loop exit
PB: predicated region body
PF: predicated region fallthrough
CT: control target
= control target key end

     0   :  { %s2347_s0 = inlined_call_operand.hbm [shape: f32[2,8,32], index: 0, kind: input, shape index: {}]   ;;  %s2348_s1 = inlined_call_operand.hbm [shape: f32[2,8,32], index: 1, kind: input, shape index: {}]   ;;  %s2349_s2 = inlined_call_operand.hbm [shape: f32[2,8,32], index: 2, kind: input, shape index: {}]   ;;  %s2350_s3 = inlined_call_operand.hbm [shape: f32[32,32], index: 3, kind: input, shape index: {}]   ;;  %s2351_s4 = inlined_call_operand.hbm [shape: f32[32,32], index: 4, kind: input, shape index: {}]   ;;  %s2352_s5 = inlined_call_operand.hbm [shape: f32[32,32], index: 5, kind: input, shape index: {}]   ;;  %s2353_s6 = inlined_call_operand.hbm [shape: f32[32,32], index: 6, kind: input, shape index: {}]   ;;  %s2354_s7 = inlined_call_operand.vmem [shape: f32[1,32], index: 7, kind: input, shape index: {}]   ;;  %s2355_s8 = inlined_call_operand.hbm [shape: f32[2,8,32], index: 8, kind: output, shape index: {}]  }
   0x1   :  { %2381 = sst [smem:[#allocation26_spill]] %s2348_s1 }
   0x2   :  { %2382 = sst [smem:[#allocation27_spill]] %s2350_s3 }
   0x3   :  { %2383 = sst [smem:[#allocation28_spill]] %s2352_s5 }
   0x4   :  { %2384 = sst [smem:[#allocation29_spill]] %s2355_s8 }
   0x5   :  { %13 = vsyncpa [#allocation3], 0 }
   0x6   :  { %15 = vsyncpa [#allocation3 + $0x1], 0 }
   0x7   :  { %16 = vsyncpa [#allocation6], 0 }
   0x8   :  { %18 = vsyncpa [#allocation6 + $0x1], 0 }
   0x9   :  { %19 = vsyncpa [#allocation9], 0 }
   0xa   :  { %20 = vsyncpa [#allocation12], 0 }
   0xb   :  { %21 = vsyncpa [#allocation4], 0 }
   0xc   :  { %23 = vsyncpa [#allocation4 + $0x1], 0  ;;  %s1903_s27 = smov 0   ;;  %s1905_s28 = smov 0  }
   0xd   :  { %s1907_s29 = smov 0   ;;  %s1909_s30 = smov 0  }
   0xe LB: > { %2385 = sst [smem:[#allocation20_spill]] %s1826_s27  ;;  %s1840_s9 = smov [#allocation8]   ;;  %s1838_s30 = sphi %s1909_s30, %s2424_s30   ;;  %s1834_s29 = sphi %s1907_s29, %s2428_s29   ;;  %s1830_s28 = sphi %s1905_s28, %s2427_s28   ;;  %s1826_s27 = sphi %s1903_s27, %s2426_s27  }
   0xf   : > { %2386 = sst [smem:[#allocation21_spill]] %s1838_s30  ;;  %s255_s10 = sshll.u32 %s1840_s9, 4  ;;  %s1929_s10 = int_to_ptr.vmem [resolvable:$true] %s255_s10 }
  0x10   : > { %s1924_s11 = sadd.s32 4294967295, %s1838_s30   ;;  %p1289_p0 = scmp.ge.s32.totalorder %s1838_s30, 1 }
  0x11   : > { %p2366_p1 = scmp.eq.s32.totalorder %s1924_s11, 0  ;;  %p243_p2 = scmp.lt.s32.totalorder %s1838_s30, 3 }
  0x12   : > { %s1841_s13 = smov [#allocation11]   ;;  %s2389_s3 = sld [smem:[#allocation27_spill]] }
  0x13   : > { %p1931_p3 = pnand %p1289_p0, %p243_p2  ;;  %s281_s14 = sshll.u32 %s1841_s13, 4  ;;  %s1944_s14 = int_to_ptr.vmem [resolvable:$true] %s281_s14 }
  0x15   : > { %s2387_s12 = scalar_select %p1931_p3, 1, 0 }
  0x16   : > { %p1459_p5 = pneg %p1931_p3 }
  0x18   : > { %p1940_p6 = pnand %p1459_p5, %p2366_p1  ;;  %s1558_s18 = scalar_lea.hbm %s2389_s3, 512 }
  0x19   : > { %p1559_p7 = scmp.ne.s32.totalorder %s2389_s3, %s1558_s18  ;;  %p1565_p11 = scmp.lt.u32.totalorder %s1558_s18, %s2389_s3 }
  0x1a   : > { %s2388_s15 = scalar_select %p1940_p6, 1, 0 }
  0x1b   : > { %p1954_p8 = pneg %p1940_p6 }
  0x1d   : > { %s2390_s21 = scalar_select %p1954_p8, 1, 0 }
  0x1e   : > { %p1561_p9 = pnand %p1954_p8, %p1559_p7 }
  0x20   : > { %p1562_p10 = pneg %p1561_p9 }
  0x22   : > { %p1567_p12 = pnand %p1565_p11, %p1562_p10 }
  0x24   : > { %1570 = shalt.err (!%p1567_p12)
}
  0x25   : > { %s1571_s24 = scalar_lea.vmem %s1929_s10, 512  ;;  %p1579_p5 = scmp.lt.s32.totalorder %s1929_s10, %s1929_s10 }
  0x26   : > { %p1572_p13 = scmp.ne.s32.totalorder %s1929_s10, %s1571_s24  ;;  %p1580_p4 = scmp.lt.s32.totalorder %s1571_s24, %s1571_s24 }
  0x28   : > { %p1574_p0 = pnand %p1572_p13, %p1954_p8  ;;  %p1581_p7 = por %p1580_p4, %p1579_p5 }
  0x2a   : > { %p1575_p2 = pneg %p1574_p0 }
  0x2c   : > { %p1582_p9 = pnand %p1581_p7, %p1575_p2 }
  0x2e   : > { %1585 = shalt.err (!%p1582_p9)
}
  0x2f   : > { %s2357_s25 = smov 128   ;;  %s2360_s26 = smov 8  }
  0x30   : > { %1462 = dma.hbm_to_vmem [thread:$0]  (!%p1940_p6), %s2389_s3, 512, %s1929_s10, [#allocation9], %s2357_s25, %s2357_s25, %s2360_s26  }
  0x31   : > { %s2391_s5 = sld [smem:[#allocation28_spill]] }
  0x37   : > { %s1586_s18 = scalar_lea.hbm %s2391_s5, 512 }
  0x38   : > { %p1587_p4 = scmp.ne.s32.totalorder %s2391_s5, %s1586_s18  ;;  %p1593_p12 = scmp.lt.u32.totalorder %s1586_s18, %s2391_s5 }
  0x3a   : > { %p1589_p10 = pnand %p1587_p4, %p1954_p8 }
  0x3c   : > { %p1590_p11 = pneg %p1589_p10 }
  0x3e   : > { %p1595_p13 = pnand %p1593_p12, %p1590_p11 }
  0x40   : > { %1598 = shalt.err (!%p1595_p13)
}
  0x41   : > { %s1599_s10 = scalar_lea.vmem %s1944_s14, 512  ;;  %p1607_p7 = scmp.lt.s32.totalorder %s1944_s14, %s1944_s14 }
  0x42   : > { %p1600_p0 = scmp.ne.s32.totalorder %s1944_s14, %s1599_s10  ;;  %p1608_p9 = scmp.lt.s32.totalorder %s1599_s10, %s1599_s10 }
  0x44   : > { %p1602_p2 = pnand %p1600_p0, %p1954_p8  ;;  %p1609_p4 = por %p1608_p9, %p1607_p7 }
  0x46   : > { %p1603_p5 = pneg %p1602_p2 }
  0x48   : > { %p1610_p10 = pnand %p1609_p4, %p1603_p5 }
  0x4a   : > { %1613 = shalt.err (!%p1610_p10)
}
  0x4b   : > { %1468 = dma.hbm_to_vmem [thread:$0]  (!%p1940_p6), %s2391_s5, 512, %s1944_s14, [#allocation12], %s2357_s25, %s2357_s25, %s2360_s26  }
  0x4c   : > { %s1288_s13 = sadd.s32 4294967294, %s1838_s30   ;;  %s2006_s16 = sadd.s32 1, %s1838_s30  }
  0x4d   : > { %2392 = sst [smem:[#allocation22_spill]] %s2006_s16  ;;  %s33_s17 = ssub.s32 %s1838_s30, %s2006_s16 }
  0x4e   : > { %s36_s18 = sadd.s32 1, %s1834_s29  ;;  %p34_p11 = scmp.eq.s32.totalorder %s33_s17, 0 }
  0x4f   : > { %p43_p12 = scmp.ne.s32.totalorder %s1834_s29, %s1830_s28  ;;  %p44_p13 = scmp.eq.s32.totalorder %s1838_s30, 0 }
  0x50   : > { %p49_p0 = scmp.ne.s32.totalorder %s1830_s28, %s1826_s27  ;;  %p230_p7 = scmp.eq.s32.totalorder %s1924_s11, 1 }
  0x51   : > { %s2017_s19 = scalar_select %p34_p11, %s1834_s29, %s36_s18  }
  0x52   : > { %p45_p2 = por %p44_p13, %p43_p12  ;;  %p2021_p5 = por %p2366_p1, %p49_p0 }
  0x53   : > { %2393 = sst [smem:[#allocation23_spill]] %s2017_s19  ;;  %p236_p9 = scmp.eq.s32.totalorder %s1288_s13, 1 }
  0x54   : > { %s2394_s20 = scalar_select %p2021_p5, 1, 0 }
  0x55   : > { %p1490_p4 = scmp.lt.s32.totalorder %s1838_s30, 2  ;;  %s2359_s14 = sand.u32 1, %s1834_s29  }
  0x56   : > { %p2028_p10 = por %p230_p7, %p43_p12  ;;  %p2032_p3 = por %p236_p9, %p49_p0 }
  0x57   : > { %s2038_s10 = sshll.u32 %s2359_s14, 3  ;;  %s2041_s24 = sshll.u32 %s1838_s30, 7 }
  0x58   : > { %s2395_s22 = scalar_select %p2028_p10, 1, 0 }
  0x59   : > { %s2397_s23 = scalar_select %p2032_p3, 1, 0 }
  0x5a   : > { %2396 = sst [smem:[#allocation24_spill]] %s2395_s22  ;;  %p2043_p11 = pnand %p1490_p4, %p45_p2 }
  0x5b   : > { %2398 = sst [smem:[#allocation25_spill]] %s2397_s23  ;;  %s329_s13 = sand.u32 1, %s1838_s30  }
  0x5c   : > { %s2399_s9 = scalar_select %p2043_p11, 1, 0 }
  0x5d   : > { %s2400_s1 = sld [smem:[#allocation26_spill]]  ;;  %s333_s14 = scalar_lea.vmem [#allocation5], %s2038_s10 }
  0x5e   : > { %s340_s26 = sshll.u32 %s333_s14, 4  ;;  %s1844_s3 = smov [#allocation10]   ;;  %s2055_s26 = int_to_ptr.vmem [resolvable:$true] %s340_s26 }
  0x5f   : > { %s2057_s5 = sshll.u32 %s1844_s3, 4  ;;  %s2059_s19 = scalar_lea.sflag [#allocation6], %s329_s13  ;;  %s269_s5 = int_to_ptr.vmem [resolvable:$true] %s2057_s5 }
  0x60   : > { %p2065_p13 = pneg %p2043_p11 }
  0x62   : > { %s2401_s17 = scalar_select %p2065_p13, 1, 0 }
  0x63   : > { %s2052_s25 = scalar_lea.hbm %s2400_s1, %s2041_s24  ;;  %s1619_s30 = scalar_lea.hbm %s2400_s1, 256 }
  0x64   : > { %s1614_s16 = scalar_lea.hbm %s2052_s25, 128  ;;  %p1620_p7 = scmp.lt.u32.totalorder %s2052_s25, %s2400_s1 }
  0x65   : > { %p1615_p12 = scmp.ne.s32.totalorder %s2052_s25, %s1614_s16  ;;  %p1621_p9 = scmp.lt.u32.totalorder %s1619_s30, %s1614_s16 }
  0x66   : > { %p1623_p1 = scmp.lt.u32.totalorder %s1614_s16, %s2052_s25 }
  0x67   : > { %p1617_p0 = pnand %p2065_p13, %p1615_p12  ;;  %p1622_p4 = por %p1621_p9, %p1620_p7 }
  0x69   : > { %p1618_p2 = pneg %p1617_p0  ;;  %p1624_p3 = por %p1623_p1, %p1622_p4 }
  0x6b   : > { %p1625_p10 = pnand %p1624_p3, %p1618_p2 }
  0x6d   : > { %1628 = shalt.err (!%p1625_p10)
}
  0x6e   : > { %s1629_s13 = scalar_lea.vmem %s2055_s26, 128  ;;  %s1845_s18 = smov [#allocation5]  }
  0x6f   : > { %p1630_p12 = scmp.ne.s32.totalorder %s2055_s26, %s1629_s13  ;;  %s1634_s14 = sshll.u32 %s1845_s18, 4  ;;  %s1635_s14 = int_to_ptr.vmem [resolvable:$false] %s1634_s14 }
  0x70   : > { %s1636_s23 = scalar_lea.vmem %s1635_s14, 256  ;;  %p1637_p6 = scmp.lt.s32.totalorder %s2055_s26, %s1635_s14 }
  0x71   : > { %p1632_p0 = pnand %p1630_p12, %p2065_p13  ;;  %p1638_p8 = scmp.lt.s32.totalorder %s1636_s23, %s1629_s13 }
  0x73   : > { %p1633_p5 = pneg %p1632_p0  ;;  %p1639_p7 = por %p1638_p8, %p1637_p6 }
  0x75   : > { %p1640_p9 = pnand %p1639_p7, %p1633_p5 }
  0x77   : > { %1643 = shalt.err (!%p1640_p9)
}
  0x78   : > { %1478 = dma.hbm_to_vmem [thread:$0]  (!%p2043_p11), %s2052_s25, 128, %s2055_s26, %s2059_s19  }
  0x79   : > { %s1644_s3 = scalar_lea.hbm %s2351_s4, 512  ;;  %p2402_p3 = scmp.ne.s32.totalorder %s2390_s21, 0 }
  0x7a   : > { %p1645_p1 = scmp.ne.s32.totalorder %s2351_s4, %s1644_s3  ;;  %p1651_p5 = scmp.lt.u32.totalorder %s1644_s3, %s2351_s4 }
  0x7c   : > { %p1647_p6 = pnand %p1645_p1, %p2402_p3 }
  0x7e   : > { %p1648_p8 = pneg %p1647_p6 }
  0x80   : > { %p1653_p10 = pnand %p1651_p5, %p1648_p8 }
  0x82   : > { %1656 = shalt.err (!%p1653_p10)
}
  0x83   : > { %s1657_s23 = scalar_lea.vmem %s269_s5, 512  ;;  %p1665_p0 = scmp.lt.s32.totalorder %s269_s5, %s269_s5 }
  0x84   : > { %p1658_p2 = scmp.ne.s32.totalorder %s269_s5, %s1657_s23  ;;  %p1666_p7 = scmp.lt.s32.totalorder %s1657_s23, %s1657_s23 }
  0x86   : > { %p1660_p4 = pnand %p1658_p2, %p2402_p3  ;;  %p1667_p9 = por %p1666_p7, %p1665_p0 }
  0x88   : > { %p1661_p12 = pneg %p1660_p4 }
  0x8a   : > { %p1668_p11 = pnand %p1667_p9, %p1661_p12 }
  0x8c   : > { %1671 = shalt.err (!%p1668_p11)
}
  0x8d   : > { %p2403_p1 = scmp.ne.s32.totalorder %s2388_s15, 0  ;;  %s2404_s1 = smov 8  }
  0x8e   : > { %s2405_s25 = smov 128   ;;  %s1846_s16 = smov [#allocation13]  }
  0x8f   : > { %1465 = dma.hbm_to_vmem [thread:$0]  (!%p2403_p1), %s2351_s4, 512, %s269_s5, [#allocation9], %s2405_s25, %s2405_s25, %s2404_s1  }
  0x90   : > { %s294_s3 = sshll.u32 %s1846_s16, 4  ;;  %s1672_s14 = scalar_lea.hbm %s2353_s6, 512  ;;  %s295_s3 = int_to_ptr.vmem [resolvable:$true] %s294_s3 }
  0x91   : > { %p1673_p11 = scmp.ne.s32.totalorder %s2353_s6, %s1672_s14  ;;  %p1679_p5 = scmp.lt.u32.totalorder %s1672_s14, %s2353_s6 }
  0x93   : > { %p1675_p6 = pnand %p1673_p11, %p2402_p3 }
  0x95   : > { %p1676_p8 = pneg %p1675_p6 }
  0x97   : > { %p1681_p10 = pnand %p1679_p5, %p1676_p8 }
  0x99   : > { %1684 = shalt.err (!%p1681_p10)
}
  0x9a   : > { %s1685_s5 = scalar_lea.vmem %s295_s3, 512  ;;  %p1693_p0 = scmp.lt.s32.totalorder %s295_s3, %s295_s3 }
  0x9b   : > { %p1686_p2 = scmp.ne.s32.totalorder %s295_s3, %s1685_s5  ;;  %p1694_p7 = scmp.lt.s32.totalorder %s1685_s5, %s1685_s5 }
  0x9d   : > { %p1688_p4 = pnand %p1686_p2, %p2402_p3  ;;  %p1695_p9 = por %p1694_p7, %p1693_p0 }
  0x9f   : > { %p1689_p12 = pneg %p1688_p4 }
  0xa1   : > { %p1696_p13 = pnand %p1695_p9, %p1689_p12 }
  0xa3   : > { %1699 = shalt.err (!%p1696_p13)
}
  0xa4   : > { %1471 = dma.hbm_to_vmem [thread:$0]  (!%p2403_p1), %s2353_s6, 512, %s295_s3, [#allocation12], %s2405_s25, %s2405_s25, %s2404_s1  }
  0xa5   : > { %s2136_s26 = scalar_lea.hbm %s2347_s0, %s2041_s24  ;;  %s315_s15 = scalar_lea.vmem [#allocation2], %s2038_s10 }
  0xa6   : > { %s322_s30 = sshll.u32 %s315_s15, 4  ;;  %s2406_s16 = sand.u32 1, %s1834_s29   ;;  %s323_s30 = int_to_ptr.vmem [resolvable:$true] %s322_s30 }
  0xa7   : > { %s312_s18 = scalar_lea.sflag [#allocation3], %s2406_s16  ;;  %s1700_s13 = scalar_lea.hbm %s2136_s26, 128 }
  0xa8   : > { %p1701_p13 = scmp.ne.s32.totalorder %s2136_s26, %s1700_s13  ;;  %p2407_p3 = scmp.ne.s32.totalorder %s2401_s17, 0 }
  0xa9   : > { %s1705_s3 = scalar_lea.hbm %s2347_s0, 256  ;;  %p1706_p1 = scmp.lt.u32.totalorder %s2136_s26, %s2347_s0 }
  0xaa   : > { %p1703_p11 = pnand %p1701_p13, %p2407_p3  ;;  %p1707_p8 = scmp.lt.u32.totalorder %s1705_s3, %s1700_s13 }
  0xab   : > { %p1709_p10 = scmp.lt.u32.totalorder %s1700_s13, %s2136_s26 }
  0xac   : > { %p1704_p6 = pneg %p1703_p11  ;;  %p1708_p5 = por %p1707_p8, %p1706_p1 }
  0xae   : > { %p1710_p2 = por %p1709_p10, %p1708_p5 }
  0xb0   : > { %p1711_p4 = pnand %p1710_p2, %p1704_p6 }
  0xb2   : > { %1714 = shalt.err (!%p1711_p4)
}
  0xb3   : > { %s1715_s5 = scalar_lea.vmem %s323_s30, 128  ;;  %s1847_s8 = smov [#allocation2]  }
  0xb4   : > { %p1716_p12 = scmp.ne.s32.totalorder %s323_s30, %s1715_s5  ;;  %s1720_s27 = sshll.u32 %s1847_s8, 4  ;;  %s1721_s27 = int_to_ptr.vmem [resolvable:$false] %s1720_s27 }
  0xb5   : > { %s1722_s21 = scalar_lea.vmem %s1721_s27, 256  ;;  %p1723_p9 = scmp.lt.s32.totalorder %s323_s30, %s1721_s27 }
  0xb6   : > { %p1718_p0 = pnand %p1716_p12, %p2407_p3  ;;  %p1724_p13 = scmp.lt.s32.totalorder %s1722_s21, %s1715_s5 }
  0xb8   : > { %p1719_p7 = pneg %p1718_p0  ;;  %p1725_p11 = por %p1724_p13, %p1723_p9 }
  0xba   : > { %p1726_p1 = pnand %p1725_p11, %p1719_p7 }
  0xbc   : > { %1729 = shalt.err (!%p1726_p1)
}
  0xbd   : > { %p2408_p8 = scmp.ne.s32.totalorder %s2399_s9, 0  ;;  %s2162_s16 = scalar_lea.hbm %s2349_s2, %s2041_s24 }
  0xbe   : > { %s351_s13 = scalar_lea.vmem [#allocation7], %s2038_s10  ;;  %s1730_s25 = scalar_lea.hbm %s2162_s16, 128 }
  0xbf   : > { %1475 = dma.hbm_to_vmem [thread:$0]  (!%p2408_p8), %s2136_s26, 128, %s323_s30, %s312_s18  }
  0xc0   : > { %s358_s1 = sshll.u32 %s351_s13, 4  ;;  %p1731_p6 = scmp.ne.s32.totalorder %s2162_s16, %s1730_s25  ;;  %s359_s1 = int_to_ptr.vmem [resolvable:$true] %s358_s1 }
  0xc1   : > { %s1735_s26 = scalar_lea.hbm %s2349_s2, 256  ;;  %p1736_p2 = scmp.lt.u32.totalorder %s2162_s16, %s2349_s2 }
  0xc2   : > { %p1733_p5 = pnand %p1731_p6, %p2407_p3  ;;  %p1737_p4 = scmp.lt.u32.totalorder %s1735_s26, %s1730_s25 }
  0xc3   : > { %p1739_p0 = scmp.lt.u32.totalorder %s1730_s25, %s2162_s16 }
  0xc4   : > { %p1734_p10 = pneg %p1733_p5  ;;  %p1738_p12 = por %p1737_p4, %p1736_p2 }
  0xc6   : > { %p1740_p7 = por %p1739_p0, %p1738_p12 }
  0xc8   : > { %p1741_p9 = pnand %p1740_p7, %p1734_p10 }
  0xca   : > { %1744 = shalt.err (!%p1741_p9)
}
  0xcb   : > { %s1745_s10 = scalar_lea.vmem %s359_s1, 128  ;;  %s1848_s24 = smov [#allocation7]  }
  0xcc   : > { %p1746_p13 = scmp.ne.s32.totalorder %s359_s1, %s1745_s10  ;;  %s1750_s23 = sshll.u32 %s1848_s24, 4  ;;  %s1751_s23 = int_to_ptr.vmem [resolvable:$false] %s1750_s23 }
  0xcd   : > { %s1752_s5 = scalar_lea.vmem %s1751_s23, 256  ;;  %p1753_p6 = scmp.lt.s32.totalorder %s359_s1, %s1751_s23 }
  0xce   : > { %p1748_p11 = pnand %p1746_p13, %p2407_p3  ;;  %p1754_p5 = scmp.lt.s32.totalorder %s1752_s5, %s1745_s10 }
  0xd0   : > { %p1749_p1 = pneg %p1748_p11  ;;  %p1755_p8 = por %p1754_p5, %p1753_p6 }
  0xd2   : > { %p1756_p2 = pnand %p1755_p8, %p1749_p1 }
  0xd4   : > { %1759 = shalt.err (!%p1756_p2)
}
  0xd5   : > { %p2409_p4 = scmp.ne.s32.totalorder %s2399_s9, 0  ;;  %p2410_p10 = scmp.ne.s32.totalorder %s2387_s12, 0 }
  0xd6   : > { %s2186_s17 = sand.u32 (!%p2410_p10), 1, %s1830_s28   ;;  %p2411_p3 = scmp.ne.s32.totalorder (!%p2410_p10), %s2394_s20, 0 }
  0xd7   : > { %1481 = dma.hbm_to_vmem [thread:$0]  (!%p2409_p4), %s2162_s16, 128, %s359_s1, %s2059_s19  }
  0xd8   : > { %367 = sbr.rel (%p2410_p10) target bundleno = 1683 (0x693), region = 52  ;;  %s2189_s8 = sshll.u32 (!%p2410_p10), %s2186_s17, 3 }
  0xd9   : > { %s370_s27 = scalar_lea.sflag (!%p2410_p10), [#allocation3], %s2186_s17  ;;  %s373_s21 = scalar_lea.vmem (!%p2410_p10), [#allocation2], %s2189_s8 }
  0xdf   : > { %1805 = dma.done.wait (%p2411_p3), %s370_s27, 128  }
  0xe0   : > { %1807 = vsyncadd (%p2411_p3), %s370_s27, 4294967168  ;;  %s378_s12 = sand.u32 1, %s1924_s11   ;;  %s382_s9 = scalar_lea.vmem [#allocation5], %s2189_s8 }
  0xe1   : > { %s379_s19 = scalar_lea.sflag [#allocation6], %s378_s12 }
  0xe2   : > { %1809 = dma.done.wait (%p2411_p3), %s379_s19, 256  }
  0xe3   : > { %1811 = vsyncadd (%p2411_p3), %s379_s19, 4294967040  ;;  %s391_s22 = scalar_lea.vmem [#allocation7], %s2189_s8  ;;  %p2412_p8 = scmp.eq.s32.totalorder %s1924_s11, 0 }
  0xe5   : > { %1813 = dma.done.wait (%p2412_p8), [#allocation9], 1024   ;;  %p2413_p12 = pmov %p2412_p8 }
  0xe6   : > { %p2414_p0 = pmov %p2412_p8 }
  0xe7   : > { %1815 = vsyncadd (%p2413_p12), [#allocation9], 4294966272 }
  0xe8   : > { %1817 = dma.done.wait (%p2414_p0), [#allocation12], 1024   ;;  %p2415_p7 = pmov %p2414_p0 }
  0xe9   : > { %v1849_v0 = vmov 0.0   ;;  %vm1850_vm0 = vmmov 0   ;;  %v508_v1 = vld [vmem:[#allocation10] sm:$0xff]  ;;  %v509_v2 = vld [vmem:[#allocation10 + $0x8] sm:$0xff]  ;;  %v510_v6 = vld [vmem:[#allocation10 + $0x10] sm:$0xff]  ;;  %vm463_vm1 = vcmask 261120  }
  0xea   : > { %1819 = vsyncadd (%p2415_p7), [#allocation12], 4294966272  ;;  %1363 = vmatprep.subr.bf16.mxu1 %v1849_v0  ;;  %1355 = vmatprep.subr.bf16.mxu0 %v1849_v0  ;;  %v457_v3 = vld [vmem:[#allocation8] sm:$0xff]  ;;  %v512_v4 = vpack.c.bf16 %v509_v2, %v508_v1  ;;  %v458_v5 = vld [vmem:[#allocation8 + $0x8] sm:$0xff]  ;;  %vm609_vm2 = vcmask 64512   ;;  %s1851_s20 = smov 112  }
  0xeb   : > { %1367 = vmatprep.mubr.msk.bf16.mxu1 %vm1850_vm0, %v1849_v0  ;;  %1359 = vmatprep.mubr.msk.bf16.mxu0 %vm1850_vm0, %v1849_v0  ;;  %v511_v7 = vld [vmem:[#allocation10 + $0x18] sm:$0xff]  ;;  %v461_v8 = vpack.c.bf16 %v458_v5, %v457_v3  ;;  %v459_v9 = vld [vmem:[#allocation8 + $0x10] sm:$0xff]  ;;  %v453_v12 = vld [vmem:[%s382_s9] sm:$0xff]  ;;  %s1852_s15 = smov 120   ;;  %s1853_s16 = smov 104   ;;  %vm671_vm3 = vcmask 1043456  }
  0xec   : > { %v460_v10 = vld [vmem:[#allocation8 + $0x18] sm:$0xff]  ;;  %1364 = vmatpush3.bf16.msra.mxu1 %v512_v4  ;;  %v513_v11 = vpack.c.bf16 %v511_v7, %v510_v6  ;;  %v454_v15 = vpack.c.bf16 %v453_v12, %v453_v12  ;;  %v557_v29 = vld [vmem:[#allocation11] sm:$0xff]  ;;  %v558_v30 = vld [vmem:[#allocation11 + $0x8] sm:$0xff]  ;;  %s1854_s13 = smov 8   ;;  %s1855_s1 = smov 16   ;;  %vm1061_vm4 = vcmask 130048  }
  0xed   : > { %1356 = vmatpush3.bf16.msra.mxu0 %v461_v8  ;;  %1365 = vmatprep.subr.bf16.mxu1 %v1849_v0  ;;  %v462_v13 = vpack.c.bf16 %v460_v10, %v459_v9  ;;  %v451_v14 = vld [vmem:[%s373_s21] sm:$0xff]  ;;  %v561_v32 = vpack.c.bf16 %v558_v30, %v557_v29  ;;  %s1856_s25 = smov 24   ;;  %vm1063_vm5 = vcmask 195584   ;;  %s2416_s26 = sld [smem:[#allocation24_spill]] }
  0xee   : > { %1357 = vmatprep.subr.bf16.mxu0 %v1849_v0  ;;  %v452_v16 = vpack.c.bf16 %v451_v14, %v451_v14  ;;  %v559_v31 = vld [vmem:[#allocation11 + $0x10] sm:$0xff]  ;;  %v560_v33 = vld [vmem:[#allocation11 + $0x18] sm:$0xff]  ;;  %s1324_s30 = sshll.u32 %s1924_s11, 7  ;;  %s449_s18 = scalar_lea.vmem [#allocation14], %s2189_s8 }
  0xef   : > { %v562_v34 = vpack.c.bf16 %v560_v33, %v559_v31  ;;  %v455_v35 = vld [vmem:[%s391_s22] sm:$0xff]  ;;  %s1137_s10 = sshll.u32 %s449_s18, 4  ;;  %s2417_s5 = sld [smem:[#allocation29_spill]]  ;;  %s2304_s10 = int_to_ptr.vmem [resolvable:$true] %s1137_s10 }
  0xf0   : > { %1366 = vmatpush3.bf16.msra.mxu1 %v513_v11  ;;  %v456_v36 = vpack.c.bf16 %v455_v35, %v455_v35  ;;  %s1124_s11 = scalar_lea.sflag [#allocation4], %s2186_s17  ;;  %s1760_s8 = scalar_lea.vmem %s2304_s10, 128 }
  0xf1   : > { %1358 = vmatpush3.bf16.msra.mxu0 %v462_v13  ;;  %1379 = vmatprep.subr.bf16.mxu1 %v1849_v0  ;;  %p1761_p9 = scmp.ne.s32.totalorder %s2304_s10, %s1760_s8  ;;  %s1857_s21 = smov [#allocation14]  }
  0xf2   : > { %1371 = vmatprep.subr.bf16.mxu0 %v1849_v0  ;;  %s1764_s12 = sshll.u32 %s1857_s21, 4  ;;  %s1765_s12 = int_to_ptr.vmem [resolvable:$false] %s1764_s12 }
  0xf3   : > { %1368 = vmatmul.mubr.msk.bf16.vlgmr.msra.gmra.mrb[0].mxu1 %vm463_vm1, %v454_v15  ;;  %p2418_p13 = scmp.ne.s32.totalorder %s2416_s26, 0  ;;  %s1766_s19 = scalar_lea.vmem %s1765_s12, 256 }
  0xf4   : > { %1360 = vmatmul.mubr.msk.bf16.vlgmr.msra.gmra.mrb[0].mxu0 %vm463_vm1, %v452_v16  ;;  %1381 = vmatprep.mubr.msk.bf16.mxu1 %vm1850_vm0, %v1849_v0  ;;  %p1767_p6 = scmp.lt.s32.totalorder %s2304_s10, %s1765_s12  ;;  %p1768_p5 = scmp.lt.s32.totalorder %s1766_s19, %s1760_s8 }
  0xf5   : > { %1375 = vmatprep.mubr.msk.bf16.mxu0 %vm1850_vm0, %v1849_v0  ;;  %1372 = vmatpush3.bf16.msra.mxu0 %v561_v32  ;;  %s2302_s27 = scalar_lea.hbm %s2417_s5, %s1324_s30  ;;  %p1762_p11 = pnand %p1761_p9, %p2418_p13 }
  0xf6   : > { %1373 = vmatprep.subr.bf16.mxu0 %v1849_v0  ;;  %p1769_p2 = por %p1768_p5, %p1767_p6 }
  0xf7   : > { %p1763_p1 = pneg %p1762_p11 }
  0xf9   : > { %1374 = vmatpush3.bf16.msra.mxu0 %v562_v34  ;;  %p1770_p4 = pnand %p1769_p2, %p1763_p1 }
  0xfa   : > { %1385 = vmatprep.subr.bf16.mxu0 %v1849_v0 }
  0xfc   : > { %1376 = vmatmul.mubr.msk.bf16.vlgmr.msra.gmra.mrb[4].mxu0 %vm463_vm1, %v456_v36 }
  0xfd   : > { %1387 = vmatprep.mubr.msk.bf16.mxu0 %vm1850_vm0, %v1849_v0 }
 0x1c6   : > { %v551_v17 = vpop.f32.mrb[0].mxu1 }
 0x1c7   : > { %v607_v18 = vpack.c.bf16 %v551_v17, %v551_v17  ;;  %v1369_v19 = vpop.f32.mrb[1].mxu1  ;;  %v501_v20 = vpop.f32.mrb[0].mxu0 }
 0x1c8   : > { %v507_v21 = vmul.f32 0.35355338, %v501_v20  ;;  %v554_v22 = vpop.f32.mrb[2].mxu1  ;;  %v1361_v23 = vpop.f32.mrb[1].mxu0 }
 0x1c9   : > { %830 = vrot.lane.b32.xlu1 %v607_v18, %s1851_s20  ;;  %719 = vrot.lane.b32.xlu0 %v607_v18, %s1852_s15  ;;  %v1370_v24 = vpop.f32.mrb[3].mxu1  ;;  %v614_v25 = vsel %vm609_vm2, %v607_v18, 0  ;;  %v504_v26 = vpop.f32.mrb[2].mxu0 }
 0x1ca   : > { %v606_v27 = vpack.c.bf16 %v507_v21, %v507_v21  ;;  %1380 = vmatpush3.bf16.xpose.msra.mxu1 %v614_v25  ;;  %v1362_v28 = vpop.f32.mrb[3].mxu0 }
 0x1cb   : > { %1391 = vmatprep.subr.bf16.mxu1 %v1849_v0 }
 0x1cd   : > { %828 = vrot.lane.b32.xlu1 %v606_v27, %s1851_s20  ;;  %716 = vrot.lane.b32.xlu0 %v606_v27, %s1852_s15 }
 0x1cf   : > { %v600_v51 = vpop.f32.mrb[4].mxu0 }
 0x1d0   : > { %v608_v52 = vpack.c.bf16 %v600_v51, %v600_v51  ;;  %v1377_v53 = vpop.f32.mrb[5].mxu0 }
 0x1d1   : > { %938 = vrot.lane.b32.xlu1 %v606_v27, %s1853_s16  ;;  %940 = vrot.lane.b32.xlu0 %v607_v18, %s1853_s16  ;;  %v603_v54 = vpop.f32.mrb[6].mxu0 }
 0x1d2   : > { %1382 = vmatmul.mubr.msk.bf16.vlgmr.msra.gmra.mrb[4].mxu1 %vm609_vm2, %v606_v27  ;;  %v1378_v55 = vpop.f32.mrb[7].mxu0  ;;  %v673_v56 = vsel %vm671_vm3, %v608_v52, 0 }
 0x1d3   : > { %1393 = vmatprep.mubr.msk.bf16.mxu1 %vm1850_vm0, %v1849_v0  ;;  %1386 = vmatpush3.bf16.msra.mxu0 %v673_v56  ;;  %v1066_v55 = vld [vmem:[#allocation13] sm:$0xff]  ;;  %v1067_v56 = vld [vmem:[#allocation13 + $0x8] sm:$0xff] }
 0x1d4   : > { %1397 = vmatprep.subr.bf16.mxu0 %v1849_v0 }
 0x23b   : > { %v720_v37 = vpop.permute.xlu0 %719  ;;  %v831_v39 = vpop.permute.xlu1 %830 }
 0x23c   : > { %v725_v38 = vsel %vm609_vm2, %v720_v37, 0  ;;  %v836_v41 = vsel %vm609_vm2, %v831_v39, 0 }
 0x23d   : > { %1392 = vmatpush3.bf16.xpose.msra.mxu1 %v725_v38 }
 0x23e   : > { %1403 = vmatprep.subr.bf16.mxu1 %v1849_v0 }
 0x23f   : > { %v717_v40 = vpop.permute.xlu0 %716  ;;  %v829_v43 = vpop.permute.xlu1 %828 }
 0x243   : > { %v941_v42 = vpop.permute.xlu0 %940  ;;  %v939_v45 = vpop.permute.xlu1 %938 }
 0x244   : > { %1394 = vmatmul.mubr.msk.bf16.vlgmr.msra.gmra.mrb[8].mxu1 %vm609_vm2, %v717_v40  ;;  %v946_v44 = vsel %vm609_vm2, %v941_v42, 0 }
 0x245   : > { %1404 = vmatpush3.bf16.xpose.msra.mxu1 %v836_v41  ;;  %1405 = vmatprep.mubr.msk.bf16.mxu1 %vm1850_vm0, %v1849_v0 }
 0x246   : > { %1415 = vmatprep.subr.bf16.mxu1 %v1849_v0 }
 0x24c   : > { %1406 = vmatmul.mubr.msk.bf16.vlgmr.msra.gmra.mrb[12].mxu1 %vm609_vm2, %v829_v43 }
 0x24d   : > { %1416 = vmatpush3.bf16.xpose.msra.mxu1 %v946_v44  ;;  %1417 = vmatprep.mubr.msk.bf16.mxu1 %vm1850_vm0, %v1849_v0 }
 0x24e   : > { %1427 = vmatprep.subr.bf16.mxu1 %v1849_v0 }
 0x254   : > { %1418 = vmatmul.mubr.msk.bf16.vlgmr.msra.gmra.mrb[16].mxu1 %vm609_vm2, %v939_v45 }
 0x255   : > { %1431 = vmatprep.mubr.msk.bf16.mxu1 %vm1850_vm0, %v1849_v0 }
 0x2a5   : > { %v650_v46 = vpop.f32.mrb[4].mxu1 }
 0x2a6   : > { %v1383_v47 = vpop.f32.mrb[5].mxu1  ;;  %v656_v48 = vsel %vm609_vm2, %v650_v46, -inf }
 0x2a7   : > { %657 = vmax.xlane.f32.xlu0 %v656_v48  ;;  %v653_v49 = vpop.f32.mrb[6].mxu1 }
 0x2a8   : > { %v1384_v50 = vpop.f32.mrb[7].mxu1 }
 0x317   : > { %v761_v57 = vpop.f32.mrb[8].mxu1 }
 0x318   : > { %v1395_v58 = vpop.f32.mrb[9].mxu1  ;;  %v767_v59 = vsel %vm609_vm2, %v761_v57, -inf }
 0x319   : > { %768 = vmax.xlane.f32.xlu1 %v767_v59  ;;  %v764_v60 = vpop.f32.mrb[10].mxu1 }
 0x31a   : > { %v1396_v61 = vpop.f32.mrb[11].mxu1 }
 0x31f   : > { %v872_v62 = vpop.f32.mrb[12].mxu1 }
 0x320   : > { %v1407_v63 = vpop.f32.mrb[13].mxu1  ;;  %v878_v1 = vsel %vm609_vm2, %v872_v62, -inf }
 0x321   : > { %879 = vmax.xlane.f32.xlu0 %v878_v1  ;;  %v875_v2 = vpop.f32.mrb[14].mxu1  ;;  %v1069_v63 = vld [vmem:[#allocation13 + $0x18] sm:$0xff] }
 0x322   : > { %v1408_v3 = vpop.f32.mrb[15].mxu1 }
 0x327   : > { %v982_v4 = vpop.f32.mrb[16].mxu1 }
 0x328   : > { %v1419_v5 = vpop.f32.mrb[17].mxu1  ;;  %v988_v6 = vsel %vm609_vm2, %v982_v4, -inf }
 0x329   : > { %989 = vmax.xlane.f32.xlu0 %v988_v6  ;;  %v985_v7 = vpop.f32.mrb[18].mxu1 }
 0x32a   : > { %v1420_v8 = vpop.f32.mrb[19].mxu1 }
 0x334   : > { %v658_v9 = vpop.xlane.xlu0 %657 }
 0x335   : > { %v659_v10 = vsub.f32 %v650_v46, %v658_v9 }
 0x337   : > { %v660_v11 = vmul.f32 1.442695, %v659_v10 }
 0x339   : > { %1542 = vpow2.f32 %v660_v11 }
 0x343   : > { %v1543_v12 = vpop.eup %1542 }
 0x344   : > { %v662_v13 = vsel %vm609_vm2, %v1543_v12, 0.0 }
 0x345   : > { %663 = vadd.xlane.f32.xlu1 %v662_v13 }
 0x356   : > { %780 = vrot.lane.b32.xlu1 %v608_v52, %s1852_s15 }
 0x3a6   : > { %v769_v14 = vpop.xlane.xlu1 %768 }
 0x3a7   : > { %v770_v15 = vsub.f32 %v761_v57, %v769_v14  ;;  %v1070_v57 = vpack.c.bf16 %v1067_v56, %v1066_v55 }
 0x3a9   : > { %v771_v16 = vmul.f32 1.442695, %v770_v15  ;;  %1428 = vmatpush3.bf16.msra.mxu1 %v1070_v57 }
 0x3aa   : > { %1429 = vmatprep.subr.bf16.mxu1 %v1849_v0 }
 0x3ab   : > { %1544 = vpow2.f32 %v771_v16  ;;  %v1321_v16 = vld [vmem:[%s2354_s7] ss:$0 sm:$0xff] }
 0x3ae   : > { %v880_v17 = vpop.xlane.xlu0 %879 }
 0x3af   : > { %v881_v18 = vsub.f32 %v872_v62, %v880_v17  ;;  %v1068_v62 = vld [vmem:[#allocation13 + $0x10] sm:$0xff] }
 0x3b0   : > { %v1071_v1 = vpack.c.bf16 %v1069_v63, %v1068_v62 }
 0x3b1   : > { %v882_v19 = vmul.f32 1.442695, %v881_v18 }
 0x3b2   : > { %1430 = vmatpush3.bf16.msra.mxu1 %v1071_v1 }
 0x3b3   : > { %1546 = vpow2.f32 %v882_v19 }
 0x3b5   : > { %v1545_v20 = vpop.eup %1544 }
 0x3b6   : > { %v990_v21 = vpop.xlane.xlu0 %989  ;;  %v773_v22 = vsel %vm609_vm2, %v1545_v20, 0.0 }
 0x3b7   : > { %v991_v23 = vsub.f32 %v982_v4, %v990_v21  ;;  %774 = vadd.xlane.f32.xlu0 %v773_v22 }
 0x3b9   : > { %v992_v24 = vmul.f32 1.442695, %v991_v23 }
 0x3bb   : > { %1548 = vpow2.f32 %v992_v24 }
 0x3bd   : > { %v1547_v25 = vpop.eup %1546 }
 0x3be   : > { %v884_v26 = vsel %vm609_vm2, %v1547_v25, 0.0 }
 0x3bf   : > { %885 = vadd.xlane.f32.xlu1 %v884_v26 }
 0x3c5   : > { %v1549_v27 = vpop.eup %1548 }
 0x3c6   : > { %v994_v28 = vsel %vm609_vm2, %v1549_v27, 0.0 }
 0x3c7   : > { %995 = vadd.xlane.f32.xlu0 %v994_v28 }
 0x3d0   : > { %1000 = vrot.lane.b32.xlu1 %v608_v52, %s1853_s16 }
 0x3d2   : > { %v664_v29 = vpop.xlane.xlu1 %663 }
 0x3d3   : > { %1550 = vrcp.f32 %v664_v29 }
 0x3d6   : > { %v781_v31 = vpop.permute.xlu1 %780 }
 0x3d7   : > { %v786_v34 = vsel %vm671_vm3, %v781_v31, 0 }
 0x3dd   : > { %v1551_v30 = vpop.eup %1550  ;;  %890 = vrot.lane.b32.xlu0 %v608_v52, %s1851_s20 }
 0x3de   : > { %v666_v32 = vmul.f32 %v1551_v30, %v1543_v12 }
 0x3e0   : > { %v667_v33 = vpack.c.bf16 %v666_v32, %v666_v32 }
 0x3e2   : > { %1388 = vmatmul.mubr.msk.bf16.vlgmr.msra.gmra.mrb[8].mxu0 %vm609_vm2, %v667_v33 }
 0x3e3   : > { %1398 = vmatpush3.bf16.msra.mxu0 %v786_v34  ;;  %1399 = vmatprep.mubr.msk.bf16.mxu0 %vm1850_vm0, %v1849_v0 }
 0x3e4   : > { %1409 = vmatprep.subr.bf16.mxu0 %v1849_v0 }
 0x444   : > { %v775_v35 = vpop.xlane.xlu0 %774 }
 0x445   : > { %1552 = vrcp.f32 %v775_v35 }
 0x44c   : > { %v886_v36 = vpop.xlane.xlu1 %885 }
 0x44d   : > { %1554 = vrcp.f32 %v886_v36 }
 0x44f   : > { %v1553_v37 = vpop.eup %1552 }
 0x450   : > { %v777_v38 = vmul.f32 %v1553_v37, %v1545_v20  ;;  %v1001_v45 = vpop.permute.xlu1 %1000 }
 0x451   : > { %v1006_v47 = vsel %vm671_vm3, %v1001_v45, 0 }
 0x452   : > { %v778_v39 = vpack.c.bf16 %v777_v38, %v777_v38 }
 0x454   : > { %v996_v40 = vpop.xlane.xlu0 %995  ;;  %1400 = vmatmul.mubr.msk.bf16.vlgmr.msra.gmra.mrb[12].mxu0 %vm609_vm2, %v778_v39 }
 0x455   : > { %1556 = vrcp.f32 %v996_v40  ;;  %1411 = vmatprep.mubr.msk.bf16.mxu0 %vm1850_vm0, %v1849_v0 }
 0x457   : > { %v1555_v41 = vpop.eup %1554 }
 0x458   : > { %v888_v42 = vmul.f32 %v1555_v41, %v1547_v25  ;;  %v891_v43 = vpop.permute.xlu0 %890 }
 0x459   : > { %v896_v44 = vsel %vm671_vm3, %v891_v43, 0 }
 0x45a   : > { %1410 = vmatpush3.bf16.msra.mxu0 %v896_v44  ;;  %v889_v46 = vpack.c.bf16 %v888_v42, %v888_v42 }
 0x45b   : > { %1421 = vmatprep.subr.bf16.mxu0 %v1849_v0 }
 0x45d   : > { %1412 = vmatmul.mubr.msk.bf16.vlgmr.msra.gmra.mrb[16].mxu0 %vm609_vm2, %v889_v46 }
 0x45e   : > { %1422 = vmatpush3.bf16.msra.mxu0 %v1006_v47  ;;  %1423 = vmatprep.mubr.msk.bf16.mxu0 %vm1850_vm0, %v1849_v0 }
 0x45f   : > { %v1557_v48 = vpop.eup %1556 }
 0x460   : > { %v998_v49 = vmul.f32 %v1557_v48, %v1549_v27 }
 0x462   : > { %v999_v50 = vpack.c.bf16 %v998_v49, %v998_v49 }
 0x465   : > { %1424 = vmatmul.mubr.msk.bf16.vlgmr.msra.gmra.mrb[20].mxu0 %vm609_vm2, %v999_v50 }
 0x4b5   : > { %v709_v51 = vpop.f32.mrb[8].mxu0 }
 0x4b6   : > { %v1389_v52 = vpop.f32.mrb[9].mxu0 }
 0x4b7   : > { %v712_v53 = vpop.f32.mrb[10].mxu0 }
 0x4b8   : > { %v1390_v54 = vpop.f32.mrb[11].mxu0 }
 0x527   : > { %v822_v58 = vpop.f32.mrb[12].mxu0 }
 0x528   : > { %1049 = vrot.lane.b32.xlu1 %v822_v58, %s1854_s13  ;;  %v1401_v59 = vpop.f32.mrb[13].mxu0 }
 0x529   : > { %v825_v60 = vpop.f32.mrb[14].mxu0 }
 0x52a   : > { %v1402_v61 = vpop.f32.mrb[15].mxu0 }
 0x530   : > { %v932_v2 = vpop.f32.mrb[16].mxu0 }
 0x531   : > { %1053 = vrot.lane.b32.xlu0 %v932_v2, %s1855_s1  ;;  %v1413_v3 = vpop.f32.mrb[17].mxu0 }
 0x532   : > { %v935_v4 = vpop.f32.mrb[18].mxu0 }
 0x533   : > { %v1414_v5 = vpop.f32.mrb[19].mxu0 }
 0x538   : > { %v1042_v6 = vpop.f32.mrb[20].mxu0 }
 0x539   : > { %1057 = vrot.lane.b32.xlu1 %v1042_v6, %s1856_s25  ;;  %v1425_v7 = vpop.f32.mrb[21].mxu0 }
 0x53a   : > { %v1045_v8 = vpop.f32.mrb[22].mxu0 }
 0x53b   : > { %v1426_v0 = vpop.f32.mrb[23].mxu0 }
 0x59a   : > { %v1050_v9 = vpop.permute.xlu1 %1049 }
 0x59b   : > { %v1060_v11 = vsel %vm609_vm2, %v709_v51, %v1050_v9 }
 0x5a3   : > { %v1054_v10 = vpop.permute.xlu0 %1053 }
 0x5a4   : > { %v1062_v12 = vsel %vm1061_vm4, %v1060_v11, %v1054_v10 }
 0x5ab   : > { %v1058_v13 = vpop.permute.xlu1 %1057 }
 0x5ac   : > { %v1064_v14 = vsel %vm1063_vm5, %v1062_v12, %v1058_v13 }
 0x5ad   : > { %v1065_v15 = vpack.c.bf16 %v1064_v14, %v1064_v14 }
 0x5af   : > { %1432 = vmatmul.mubr.msk.bf16.vlgmr.msra.gmra.mrb[20].mxu1 %vm463_vm1, %v1065_v15 }
 0x682   : > { %v1116_v17 = vpop.f32.mrb[20].mxu1 }
 0x683   : > { %v1117_v18 = vadd.f32 %v1321_v16, %v1116_v17  ;;  %v1433_v19 = vpop.f32.mrb[21].mxu1 }
 0x684   : > { %v1119_v20 = vpop.f32.mrb[22].mxu1 }
 0x685   : > { %v1434_v21 = vpop.f32.mrb[23].mxu1  ;;  %1122 = vst.msk [vmem:[%s449_s18] sm:$0xff] %vm463_vm1, %v1117_v18 }
 0x686   : > { %1773 = shalt.err (!%p1770_p4)
}
 0x687   : > { %s1774_s17 = scalar_lea.hbm %s2302_s27, 128  ;;  %s1778_s20 = scalar_lea.hbm %s2417_s5, 256 }
 0x688   : > { %p1775_p10 = scmp.ne.s32.totalorder %s2302_s27, %s1774_s17  ;;  %p1779_p12 = scmp.lt.u32.totalorder %s2302_s27, %s2417_s5 }
 0x689   : > { %p1780_p0 = scmp.lt.u32.totalorder %s1778_s20, %s1774_s17  ;;  %p1782_p9 = scmp.lt.u32.totalorder %s1774_s17, %s2302_s27 }
 0x68a   : > { %p1776_p3 = pnand %p1775_p10, %p2418_p13 }
 0x68b   : > { %p1781_p7 = por %p1780_p0, %p1779_p12 }
 0x68c   : > { %p1777_p8 = pneg %p1776_p3 }
 0x68d   : > { %p1783_p11 = por %p1782_p9, %p1781_p7 }
 0x68f   : > { %p1784_p1 = pnand %p1783_p11, %p1777_p8 }
 0x691   : > { %1787 = shalt.err (!%p1784_p1)
}
 0x692   : > { %1457 = dma.vmem_to_hbm [thread:$0]  (%p2418_p13), %s2304_s10, 128, %s2302_s27, %s1124_s11  }
 0x693 PF: > { %s2419_s13 = sld [smem:[#allocation20_spill]]  ;;  %s2420_s1 = sld [smem:[#allocation25_spill]] }
 0x694   : > { %s2421_s25 = sld [smem:[#allocation21_spill]] }
 0x699   : > { %s1149_s3 = sand.u32 1, %s2419_s13   ;;  %p2422_p6 = scmp.ne.s32.totalorder %s2420_s1, 0 }
 0x69a   : > { %p2423_p5 = scmp.ge.s32.totalorder %s2421_s25, 2  ;;  %s1150_s14 = scalar_lea.sflag [#allocation4], %s1149_s3 }
 0x69c   : > { %p1483_p2 = pnand %p2423_p5, %p2422_p6 }
 0x69e   : > { %1821 = dma.done.wait (!%p1483_p2), %s1150_s14, 128  }
 0x69f   : > { %1823 = vsyncadd (!%p1483_p2), %s1150_s14, 4294967168  ;;  %s2424_s30 = sld [smem:[#allocation22_spill]]  ;;  %s2425_s18 = sld [smem:[#allocation23_spill]] }
 0x6a0   : > { %s2426_s27 = smov %s1830_s28  ;;  %s2427_s28 = smov %s1834_s29 }
 0x6a5   : > { %p26_p4 = scmp.ge.s32.totalorder %s2424_s30, 4   ;;  %s2428_s29 = smov %s2425_s18 }
 0x6a7   :  { %28 = sbr.rel (!%p26_p4) target bundleno = 14 (0xe), region = 137 }
 0x6ae   :  { %1155 = vsyncpa [#allocation3], 1 }
 0x6af   :  { %1157 = vsyncpa [#allocation3 + $0x1], 1 }
 0x6b0   :  { %1158 = vsyncpa [#allocation6], 1 }
 0x6b1   :  { %1160 = vsyncpa [#allocation6 + $0x1], 1 }
 0x6b2   :  { %1161 = vsyncpa [#allocation9], 1 }
 0x6b3   :  { %1162 = vsyncpa [#allocation12], 1 }
 0x6b4   :  { %1163 = vsyncpa [#allocation4], 1 }
 0x6b5   :  { %1165 = vsyncpa [#allocation4 + $0x1], 1 }

</bundles_post_ra>
